<compile_context>
chip_gen: v7x
topology: tpu7x:2x2x1
jax: 0.10.0
libtpu: 0.0.40
codegen_flags: <defaults>
</compile_context>

<pallas_src>
import functools
import math

import jax
import jax.numpy as jnp
from jax.experimental import pallas as pl
from jax.experimental.pallas import tpu as pltpu

BOND_FEATURE_DIMS = (5, 6, 2)   # ogb-style BondEncoder vocab sizes
BN_EPS = 1e-5
LANE = 128
SUBLANE = 8


def _round_up(v, m):
    return (v + m - 1) // m * m


def _vmem_limit_bytes():
    # Target <= ~75% of physical VMEM (v5e/v6e: 128 MiB, v7x: 64 MiB per TC).
    try:
        cap = pltpu.get_tpu_info().vmem_capacity_bytes
    except Exception:
        cap = 64 * 1024 * 1024
    return int(cap * 3 // 4)


# ----------------------------- Pallas kernel ------------------------------ #
def fused_gine_kernel(*refs, num_layers, has_ew):
    """All GINEConv layers fused; grid axis 0 = layer index ('arbitrary').

    gather x_j = x[src] and the scatter-add onto destination nodes are bf16
    one-hot MXU matmuls (0/1 exact in bf16); the bond embedding is a tiny bf16
    matmul; the GINE MLP (Linear -> BN -> ReLU -> Linear) and the outer
    BatchNorm are fused with BN scales pre-folded into the bf16 weights.
    """
    if has_ew:
        (x_ref, src_oh_ref, dst_oh_ref, eoh_ref, ew_ref,
         btab_ref, w1_ref, w2_ref, c_ref, out_ref) = refs
    else:
        (x_ref, src_oh_ref, dst_oh_ref, eoh_ref,
         btab_ref, w1_ref, w2_ref, c_ref, out_ref) = refs
        ew_ref = None

    l = pl.program_id(0)
    d_pad = out_ref.shape[1]

    @pl.when(l == 0)
    def _init():
        out_ref[...] = x_ref[...]        # node state lives in the resident out block

    h = out_ref[...]                     # f32 node features (carried across layers)

    # bond embedding: [E_pad, V_pad] bf16 one-hot @ [V_pad, D_pad] bf16 table
    eemb = jnp.dot(eoh_ref[...], btab_ref[...],
                   preferred_element_type=jnp.float32)
    # message gather x_j = h[src]  (bf16 one-hot matmul; one-hot side exact)
    x_j = jnp.dot(src_oh_ref[...], h.astype(jnp.bfloat16),
                  preferred_element_type=jnp.float32)
    m = x_j + eemb                       # keep elementwise chain in f32 (v5e VPU)
    if has_ew:
        m = m * ew_ref[...]
    mess = jnp.maximum(m, 0.0)
    # aggregate: scatter-add onto destination nodes (bf16 one-hot matmul)
    aggr = jnp.dot(dst_oh_ref[...], mess.astype(jnp.bfloat16),
                   preferred_element_type=jnp.float32)

    # (1 + eps_l) * x + sum_j mess   (eps row streamed in the constants block)
    hh = c_ref[2:3, :d_pad] * h + aggr
    # MLP: Linear(D,2D) -> BatchNorm(2D) -> ReLU   (BN scale folded into w1)
    h1 = jnp.maximum(
        jnp.dot(hh.astype(jnp.bfloat16), w1_ref[...],
                preferred_element_type=jnp.float32) + c_ref[0:1, :], 0.0)
    # Linear(2D,D) + outer BatchNorm(D)   (folded into w2 / c2)
    out_lin = (jnp.dot(h1.astype(jnp.bfloat16), w2_ref[...],
                       preferred_element_type=jnp.float32)
               + c_ref[1:2, :d_pad])

    # Inter-layer ReLU feeds the next layer (Dropout = identity at inference);
    # the final layer output has no ReLU and no wasted store.
    @pl.when(l < num_layers - 1)
    def _not_last():
        out_ref[...] = jnp.maximum(out_lin, 0.0)

    @pl.when(l == num_layers - 1)
    def _last():
        out_ref[...] = out_lin


# ------------------------------ JAX glue ---------------------------------- #
def bond_encode(edge_attr, tables):
    # BondEncoder: sum of per-feature embedding lookups (reference only).
    emb = jnp.zeros((edge_attr.shape[0], tables[0].shape[1]), jnp.float32)
    for i, tab in enumerate(tables):
        emb = emb + jnp.take(tab, edge_attr[:, i], axis=0)
    return emb


def gnn_mol_tail_forward(params, x, edge_index, edge_attr, batch,
                         node_adv=None, edge_adv=None):
    # TODO(synk): training-mode Dropout / batch-stat BatchNorm are stochastic
    # (training only); inference semantics implemented here.
    del batch  # unused by the reference forward
    num_layers = len(params)
    n, d = x.shape
    e = edge_index.shape[1]
    d_pad = _round_up(d, LANE)
    dh_pad = _round_up(2 * d, LANE)
    n_pad = _round_up(n, SUBLANE)
    e_pad = _round_up(e, SUBLANE)
    v_total = sum(BOND_FEATURE_DIMS)
    v_pad = _round_up(v_total, SUBLANE)

    src, dst = edge_index[0], edge_index[1]
    # TODO(synk): for large graphs replace the O(E*N) one-hot matmuls with a
    # scalar-prefetch index gather + tiled segment-sum over an edge grid axis,
    # and add a node-tile 'parallel' grid axis so v7x's 2 TensorCores share work.
    src_oh = jnp.pad(jax.nn.one_hot(src, n_pad, dtype=jnp.bfloat16),
                     ((0, e_pad - e), (0, 0)))                   # [E_pad, N_pad]
    dst_oh = jnp.pad(jax.nn.one_hot(dst, n_pad, dtype=jnp.bfloat16).T,
                     ((0, 0), (0, e_pad - e)))                   # [N_pad, E_pad]
    # concat one-hot of the 3 bond features -> in-kernel bond-embedding matmul
    eoh = jnp.concatenate(
        [jax.nn.one_hot(edge_attr[:, i], v, dtype=jnp.bfloat16)
         for i, v in enumerate(BOND_FEATURE_DIMS)], axis=1)
    eoh = jnp.pad(eoh, ((0, e_pad - e), (0, v_pad - v_total)))   # [E_pad, V_pad]

    h0 = x.astype(jnp.float32)
    if node_adv is not None:
        h0 = h0 * node_adv
    h0 = jnp.pad(h0, ((0, n_pad - n), (0, d_pad - d)))

    has_ew = edge_adv is not None

    # Per-layer params: fold BN scales into bf16 weights; pack c1/c2/(1+eps)
    # into a single small f32 constants block per layer.
    w1_l, w2_l, bt_l, cs_l = [], [], [], []
    for p in params:
        s1 = p['bn1_g'] / jnp.sqrt(p['bn1_rv'] + BN_EPS)
        s2 = p['bno_g'] / jnp.sqrt(p['bno_rv'] + BN_EPS)
        w1f = (p['w1'] * s1[None, :]).astype(jnp.bfloat16)
        c1 = p['b1'] * s1 + p['bn1_b'] - p['bn1_rm'] * s1
        w2f = (p['w2'] * s2[None, :]).astype(jnp.bfloat16)
        c2 = p['b2'] * s2 + p['bno_b'] - p['bno_rm'] * s2
        w1_l.append(jnp.pad(w1f, ((0, d_pad - d), (0, dh_pad - 2 * d))))
        w2_l.append(jnp.pad(w2f, ((0, dh_pad - 2 * d), (0, d_pad - d))))
        btab = jnp.concatenate(p['bond_tables'], axis=0).astype(jnp.bfloat16)
        bt_l.append(jnp.pad(btab, ((0, v_pad - v_total), (0, d_pad - d))))
        cs = jnp.zeros((SUBLANE, dh_pad), jnp.float32)
        cs = cs.at[0, :2 * d].set(c1)                 # row 0: c1
        cs = cs.at[1, :d].set(c2)                     # row 1: c2
        cs = cs.at[2, :d].set(1.0 + p['eps'])         # row 2: (1 + eps)
        cs_l.append(cs)
    w1s = jnp.stack(w1_l)                       # [L, D_pad, 2D_pad]  bf16
    w2s = jnp.stack(w2_l)                       # [L, 2D_pad, D_pad]  bf16
    btabs = jnp.stack(bt_l)                     # [L, V_pad, D_pad]   bf16
    consts = jnp.stack(cs_l)                    # [L, 8, 2D_pad]      f32

    resident = lambda l: (0, 0)       # same block every layer -> stays in VMEM
    per_layer = lambda l: (l, 0, 0)   # streamed per layer (double-buffered)
    # TODO(synk): single-buffer the resident blocks (pipeline_mode=pl.Buffered(1))
    # once verified on the target jax version -- relevant for v7x's 64 MiB VMEM.

    in_specs = [
        pl.BlockSpec((n_pad, d_pad), resident),                 # x0
        pl.BlockSpec((e_pad, n_pad), resident),                 # src one-hot (bf16)
        pl.BlockSpec((n_pad, e_pad), resident),                 # dst one-hot (bf16)
        pl.BlockSpec((e_pad, v_pad), resident),                 # edge-attr one-hot
    ]
    inputs = [h0, src_oh, dst_oh, eoh]
    if has_ew:
        ew = jnp.pad(edge_adv.reshape(e, 1).astype(jnp.float32),
                     ((0, e_pad - e), (0, 0)))
        in_specs.append(pl.BlockSpec((e_pad, 1), resident))     # edge weights
        inputs.append(ew)
    in_specs += [
        pl.BlockSpec((None, v_pad, d_pad), per_layer),          # bond tables (bf16)
        pl.BlockSpec((None, d_pad, dh_pad), per_layer),         # w1 (bf16, BN folded)
        pl.BlockSpec((None, dh_pad, d_pad), per_layer),         # w2 (bf16, BN folded)
        pl.BlockSpec((None, SUBLANE, dh_pad), per_layer),       # [c1; c2; 1+eps] f32
    ]
    inputs += [btabs, w1s, w2s, consts]

    kernel = functools.partial(fused_gine_kernel, num_layers=num_layers,
                               has_ew=has_ew)
    out = pl.pallas_call(
        kernel,
        out_shape=jax.ShapeDtypeStruct((n_pad, d_pad), jnp.float32),
        grid_spec=pltpu.PrefetchScalarGridSpec(
            num_scalar_prefetch=0,
            grid=(num_layers,),
            in_specs=in_specs,
            out_specs=pl.BlockSpec((n_pad, d_pad), resident),
        ),
        compiler_params=pltpu.CompilerParams(
            dimension_semantics=("arbitrary",),      # layers are sequential
            vmem_limit_bytes=_vmem_limit_bytes(),
        ),
    )(*inputs)
    return out[:n, :d]


# --------------------------- pure-JAX reference ---------------------------- #
def ref_forward(params, x, edge_index, edge_attr, node_adv=None, edge_adv=None):
    num_layer = len(params)
    n = x.shape[0]
    src, dst = edge_index[0], edge_index[1]
    h = (x if node_adv is None else x * node_adv).astype(jnp.float32)
    for l, p in enumerate(params):
        eemb = bond_encode(edge_attr, p['bond_tables'])
        m = h[src] + eemb
        if edge_adv is not None:
            m = m * edge_adv.reshape(-1, 1)
        mess = jnp.maximum(m, 0.0)
        aggr = jax.ops.segment_sum(mess, dst, num_segments=n)
        hh = (1.0 + p['eps']) * h + aggr
        h1 = hh @ p['w1'] + p['b1']
        h1 = (h1 - p['bn1_rm']) / jnp.sqrt(p['bn1_rv'] + BN_EPS) * p['bn1_g'] + p['bn1_b']
        h1 = jnp.maximum(h1, 0.0)
        h2 = h1 @ p['w2'] + p['b2']
        out = (h2 - p['bno_rm']) / jnp.sqrt(p['bno_rv'] + BN_EPS) * p['bno_g'] + p['bno_b']
        if (num_layer > 1) and (l < num_layer - 1):
            out = jnp.maximum(out, 0.0)
        h = out
    return h


# --------------------------- deterministic init ---------------------------- #
def init_params(key, num_layer, emb_dim):
    layers = []
    for _ in range(num_layer):
        key, sub = jax.random.split(key)
        it = iter(jax.random.split(sub, 15))
        layer = dict(
            bond_tables=[0.1 * jax.random.normal(next(it), (v, emb_dim), jnp.float32)
                         for v in BOND_FEATURE_DIMS],
            eps=jnp.float32(0.0),
            w1=jax.random.normal(next(it), (emb_dim, 2 * emb_dim), jnp.float32)
               / math.sqrt(emb_dim),
            b1=0.01 * jax.random.normal(next(it), (2 * emb_dim,), jnp.float32),
            bn1_g=1.0 + 0.1 * jax.random.normal(next(it), (2 * emb_dim,), jnp.float32),
            bn1_b=0.1 * jax.random.normal(next(it), (2 * emb_dim,), jnp.float32),
            bn1_rm=0.1 * jax.random.normal(next(it), (2 * emb_dim,), jnp.float32),
            bn1_rv=0.5 + jax.random.uniform(next(it), (2 * emb_dim,), jnp.float32),
            w2=jax.random.normal(next(it), (2 * emb_dim, emb_dim), jnp.float32)
               / math.sqrt(2 * emb_dim),
            b2=0.01 * jax.random.normal(next(it), (emb_dim,), jnp.float32),
            bno_g=1.0 + 0.1 * jax.random.normal(next(it), (emb_dim,), jnp.float32),
            bno_b=0.1 * jax.random.normal(next(it), (emb_dim,), jnp.float32),
            bno_rm=0.1 * jax.random.normal(next(it), (emb_dim,), jnp.float32),
            bno_rv=0.5 + jax.random.uniform(next(it), (emb_dim,), jnp.float32),
        )
        layers.append(layer)
    return layers


if __name__ == "__main__":
    key = jax.random.PRNGKey(0)
    num_layer, emb_dim = 3, 32
    n_nodes, n_edges = 8, 16

    kp, kx, ks, kd, ka = jax.random.split(key, 5)
    params = init_params(kp, num_layer, emb_dim)
    x = jax.random.normal(kx, (n_nodes, emb_dim), jnp.float32)
    src = jax.random.randint(ks, (n_edges,), 0, n_nodes, dtype=jnp.int32)
    dst = jax.random.randint(kd, (n_edges,), 0, n_nodes, dtype=jnp.int32)
    edge_index = jnp.stack([src, dst], axis=0)
    edge_attr = jnp.stack(
        [jax.random.randint(jax.random.fold_in(ka, i), (n_edges,), 0, v,
                            dtype=jnp.int32)
         for i, v in enumerate(BOND_FEATURE_DIMS)], axis=1)
    batch = jnp.zeros((n_nodes,), jnp.int32)

    out = gnn_mol_tail_forward(params, x, edge_index, edge_attr, batch)
    out = jax.block_until_ready(out)

    ref = ref_forward(params, x, edge_index, edge_attr)
    assert out.shape == (n_nodes, emb_dim), out.shape
    # bf16 MXU path: h/mess/hh/h1 are bf16-rounded at the matmuls (one-hot /
    # accumulation exact), so compare with a tolerance scaled to the output.
    rel_err = float(jnp.max(jnp.abs(out - ref)) / (jnp.max(jnp.abs(ref)) + 1e-6))
    assert rel_err < 5e-2, rel_err
    print("KERNEL_OK")
</pallas_src>

<mosaic_0001>
module attributes {stable_mosaic.version = 11 : i64} {
  func.func @fused_gine_kernel(%arg0: i32, %arg1: memref<8x128xf32, #tpu.memory_space<vmem>>, %arg2: memref<16x8xbf16, #tpu.memory_space<vmem>>, %arg3: memref<8x16xbf16, #tpu.memory_space<vmem>>, %arg4: memref<16x16xbf16, #tpu.memory_space<vmem>>, %arg5: memref<1x16x128xbf16, #tpu.memory_space<vmem>>, %arg6: memref<1x128x128xbf16, #tpu.memory_space<vmem>>, %arg7: memref<1x128x128xbf16, #tpu.memory_space<vmem>>, %arg8: memref<1x8x128xf32, #tpu.memory_space<vmem>>, %arg9: memref<8x128xf32, #tpu.memory_space<vmem>>) attributes {dimension_semantics = [#tpu.dimension_semantics<arbitrary>], iteration_bounds = array<i64: 3>, scalar_prefetch = 0 : i64, scratch_operands = 0 : i64, tpu.core_type = #tpu.core_type<tc>, window_params = [{pipeline_mode = #tpu.pipeline_mode<synchronous>, transform_indices = @transform_0, window_bounds = array<i64: 8, 128>}, {pipeline_mode = #tpu.pipeline_mode<synchronous>, transform_indices = @transform_1, window_bounds = array<i64: 16, 8>}, {pipeline_mode = #tpu.pipeline_mode<synchronous>, transform_indices = @transform_2, window_bounds = array<i64: 8, 16>}, {pipeline_mode = #tpu.pipeline_mode<synchronous>, transform_indices = @transform_3, window_bounds = array<i64: 16, 16>}, {transform_indices = @transform_4, window_bounds = array<i64: 1, 16, 128>}, {transform_indices = @transform_5, window_bounds = array<i64: 1, 128, 128>}, {transform_indices = @transform_6, window_bounds = array<i64: 1, 128, 128>}, {transform_indices = @transform_7, window_bounds = array<i64: 1, 8, 128>}, {pipeline_mode = #tpu.pipeline_mode<synchronous>, transform_indices = @transform_8, window_bounds = array<i64: 8, 128>}]} {
    %c0_i32 = arith.constant 0 : i32
    %0 = arith.cmpi eq, %arg0, %c0_i32 : i32
    %1 = arith.extui %0 : i1 to i32
    %c0_i32_0 = arith.constant 0 : i32
    %2 = arith.cmpi ne, %1, %c0_i32_0 : i32
    scf.if %2 {
      %c0_33 = arith.constant 0 : index
      %c0_34 = arith.constant 0 : index
      %46 = vector.load %arg1[%c0_33, %c0_34] : memref<8x128xf32, #tpu.memory_space<vmem>>, vector<8x128xf32>
      %c0_35 = arith.constant 0 : index
      %c0_36 = arith.constant 0 : index
      %47 = vector.load %arg9[%c0_35, %c0_36] : memref<8x128xf32, #tpu.memory_space<vmem>>, vector<8x128xf32>
      tpu.vector_store %arg9[%c0_35, %c0_36], %46 {strides = array<i32>} : memref<8x128xf32, #tpu.memory_space<vmem>>, vector<8x128xf32>,
    } else {
    }
    %c0 = arith.constant 0 : index
    %c0_1 = arith.constant 0 : index
    %3 = vector.load %arg9[%c0, %c0_1] : memref<8x128xf32, #tpu.memory_space<vmem>>, vector<8x128xf32>
    %c0_2 = arith.constant 0 : index
    %c0_3 = arith.constant 0 : index
    %4 = vector.load %arg4[%c0_2, %c0_3] : memref<16x16xbf16, #tpu.memory_space<vmem>>, vector<16x16xbf16>
    %c0_4 = arith.constant 0 : index
    %c0_5 = arith.constant 0 : index
    %c0_6 = arith.constant 0 : index
    %5 = vector.load %arg5[%c0_4, %c0_5, %c0_6] : memref<1x16x128xbf16, #tpu.memory_space<vmem>>, vector<1x16x128xbf16>
    %6 = vector.shape_cast %5 : vector<1x16x128xbf16> to vector<16x128xbf16>
    %cst = arith.constant dense<0.000000e+00> : vector<16x128xf32>
    %7 = tpu.matmul %4, %6, %cst {dimension_numbers = #tpu.dot_dimension_numbers<[1], [0], [0], [1], [0, 0, 1, 1], [], []>} : vector<16x16xbf16>, vector<16x128xbf16>, vector<16x128xf32> -> vector<16x128xf32>
    %c0_7 = arith.constant 0 : index
    %c0_8 = arith.constant 0 : index
    %8 = vector.load %arg2[%c0_7, %c0_8] : memref<16x8xbf16, #tpu.memory_space<vmem>>, vector<16x8xbf16>
    %9 = arith.truncf %3 : vector<8x128xf32> to vector<8x128xbf16>
    %cst_9 = arith.constant dense<0.000000e+00> : vector<16x128xf32>
    %10 = tpu.matmul %8, %9, %cst_9 {dimension_numbers = #tpu.dot_dimension_numbers<[1], [0], [0], [1], [0, 0, 1, 1], [], []>} : vector<16x8xbf16>, vector<8x128xbf16>, vector<16x128xf32> -> vector<16x128xf32>
    %11 = arith.addf %10, %7 : vector<16x128xf32>
    %cst_10 = arith.constant 0.000000e+00 : f32
    %12 = vector.broadcast %cst_10 : f32 to vector<16x128xf32>
    %13 = arith.maximumf %11, %12 : vector<16x128xf32>
    %c0_11 = arith.constant 0 : index
    %c0_12 = arith.constant 0 : index
    %14 = vector.load %arg3[%c0_11, %c0_12] : memref<8x16xbf16, #tpu.memory_space<vmem>>, vector<8x16xbf16>
    %15 = arith.truncf %13 : vector<16x128xf32> to vector<16x128xbf16>
    %cst_13 = arith.constant dense<0.000000e+00> : vector<8x128xf32>
    %16 = tpu.matmul %14, %15, %cst_13 {dimension_numbers = #tpu.dot_dimension_numbers<[1], [0], [0], [1], [0, 0, 1, 1], [], []>} : vector<8x16xbf16>, vector<16x128xbf16>, vector<8x128xf32> -> vector<8x128xf32>
    %c0_14 = arith.constant 0 : index
    %c2 = arith.constant 2 : index
    %c0_15 = arith.constant 0 : index
    %17 = vector.load %arg8[%c0_14, %c2, %c0_15] : memref<1x8x128xf32, #tpu.memory_space<vmem>>, vector<1x1x128xf32>
    %18 = vector.shape_cast %17 : vector<1x1x128xf32> to vector<1x128xf32>
    %19 = vector.broadcast %18 : vector<1x128xf32> to vector<8x128xf32>
    %20 = arith.mulf %19, %3 : vector<8x128xf32>
    %21 = arith.addf %20, %16 : vector<8x128xf32>
    %22 = arith.truncf %21 : vector<8x128xf32> to vector<8x128xbf16>
    %c0_16 = arith.constant 0 : index
    %c0_17 = arith.constant 0 : index
    %c0_18 = arith.constant 0 : index
    %23 = vector.load %arg6[%c0_16, %c0_17, %c0_18] : memref<1x128x128xbf16, #tpu.memory_space<vmem>>, vector<1x128x128xbf16>
    %24 = vector.shape_cast %23 : vector<1x128x128xbf16> to vector<128x128xbf16>
    %cst_19 = arith.constant dense<0.000000e+00> : vector<8x128xf32>
    %25 = tpu.matmul %22, %24, %cst_19 {dimension_numbers = #tpu.dot_dimension_numbers<[1], [0], [0], [1], [0, 0, 1, 1], [], []>} : vector<8x128xbf16>, vector<128x128xbf16>, vector<8x128xf32> -> vector<8x128xf32>
    %c0_20 = arith.constant 0 : index
    %c0_21 = arith.constant 0 : index
    %c0_22 = arith.constant 0 : index
    %26 = vector.load %arg8[%c0_20, %c0_21, %c0_22] : memref<1x8x128xf32, #tpu.memory_space<vmem>>, vector<1x1x128xf32>
    %27 = vector.shape_cast %26 : vector<1x1x128xf32> to vector<1x128xf32>
    %28 = vector.broadcast %27 : vector<1x128xf32> to vector<8x128xf32>
    %29 = arith.addf %25, %28 : vector<8x128xf32>
    %cst_23 = arith.constant 0.000000e+00 : f32
    %30 = vector.broadcast %cst_23 : f32 to vector<8x128xf32>
    %31 = arith.maximumf %29, %30 : vector<8x128xf32>
    %32 = arith.truncf %31 : vector<8x128xf32> to vector<8x128xbf16>
    %c0_24 = arith.constant 0 : index
    %c0_25 = arith.constant 0 : index
    %c0_26 = arith.constant 0 : index
    %33 = vector.load %arg7[%c0_24, %c0_25, %c0_26] : memref<1x128x128xbf16, #tpu.memory_space<vmem>>, vector<1x128x128xbf16>
    %34 = vector.shape_cast %33 : vector<1x128x128xbf16> to vector<128x128xbf16>
    %cst_27 = arith.constant dense<0.000000e+00> : vector<8x128xf32>
    %35 = tpu.matmul %32, %34, %cst_27 {dimension_numbers = #tpu.dot_dimension_numbers<[1], [0], [0], [1], [0, 0, 1, 1], [], []>} : vector<8x128xbf16>, vector<128x128xbf16>, vector<8x128xf32> -> vector<8x128xf32>
    %c0_28 = arith.constant 0 : index
    %c1 = arith.constant 1 : index
    %c0_29 = arith.constant 0 : index
    %36 = vector.load %arg8[%c0_28, %c1, %c0_29] : memref<1x8x128xf32, #tpu.memory_space<vmem>>, vector<1x1x128xf32>
    %37 = vector.shape_cast %36 : vector<1x1x128xf32> to vector<1x128xf32>
    %38 = vector.broadcast %37 : vector<1x128xf32> to vector<8x128xf32>
    %39 = arith.addf %35, %38 : vector<8x128xf32>
    %c2_i32 = arith.constant 2 : i32
    %40 = arith.cmpi slt, %arg0, %c2_i32 : i32
    %41 = arith.extui %40 : i1 to i32
    %c0_i32_30 = arith.constant 0 : i32
    %42 = arith.cmpi ne, %41, %c0_i32_30 : i32
    scf.if %42 {
      %cst_33 = arith.constant 0.000000e+00 : f32
      %46 = vector.broadcast %cst_33 : f32 to vector<8x128xf32>
      %47 = arith.maximumf %39, %46 : vector<8x128xf32>
      %c0_34 = arith.constant 0 : index
      %c0_35 = arith.constant 0 : index
      %48 = vector.load %arg9[%c0_34, %c0_35] : memref<8x128xf32, #tpu.memory_space<vmem>>, vector<8x128xf32>
      tpu.vector_store %arg9[%c0_34, %c0_35], %47 {strides = array<i32>} : memref<8x128xf32, #tpu.memory_space<vmem>>, vector<8x128xf32>,
    } else {
    }
    %c2_i32_31 = arith.constant 2 : i32
    %43 = arith.cmpi eq, %arg0, %c2_i32_31 : i32
    %44 = arith.extui %43 : i1 to i32
    %c0_i32_32 = arith.constant 0 : i32
    %45 = arith.cmpi ne, %44, %c0_i32_32 : i32
    scf.if %45 {
      %c0_33 = arith.constant 0 : index
      %c0_34 = arith.constant 0 : index
      %46 = vector.load %arg9[%c0_33, %c0_34] : memref<8x128xf32, #tpu.memory_space<vmem>>, vector<8x128xf32>
      tpu.vector_store %arg9[%c0_33, %c0_34], %39 {strides = array<i32>} : memref<8x128xf32, #tpu.memory_space<vmem>>, vector<8x128xf32>,
    } else {
    }
    return
  }
  func.func @transform_0(%arg0: i32) -> (i32, i32) {
    %c0_i32 = arith.constant 0 : i32
    %c0_i32_0 = arith.constant 0 : i32
    %c0_i32_1 = arith.constant 0 : i32
    return %c0_i32, %c0_i32_0 : i32, i32
  }
  func.func @transform_1(%arg0: i32) -> (i32, i32) {
    %c0_i32 = arith.constant 0 : i32
    %c0_i32_0 = arith.constant 0 : i32
    %c0_i32_1 = arith.constant 0 : i32
    return %c0_i32, %c0_i32_0 : i32, i32
  }
  func.func @transform_2(%arg0: i32) -> (i32, i32) {
    %c0_i32 = arith.constant 0 : i32
    %c0_i32_0 = arith.constant 0 : i32
    %c0_i32_1 = arith.constant 0 : i32
    return %c0_i32, %c0_i32_0 : i32, i32
  }
  func.func @transform_3(%arg0: i32) -> (i32, i32) {
    %c0_i32 = arith.constant 0 : i32
    %c0_i32_0 = arith.constant 0 : i32
    %c0_i32_1 = arith.constant 0 : i32
    return %c0_i32, %c0_i32_0 : i32, i32
  }
  func.func @transform_4(%arg0: i32) -> (i32, i32, i32) {
    %c0_i32 = arith.constant 0 : i32
    %c0_i32_0 = arith.constant 0 : i32
    %c0_i32_1 = arith.constant 0 : i32
    return %arg0, %c0_i32, %c0_i32_0 : i32, i32, i32
  }
  func.func @transform_5(%arg0: i32) -> (i32, i32, i32) {
    %c0_i32 = arith.constant 0 : i32
    %c0_i32_0 = arith.constant 0 : i32
    %c0_i32_1 = arith.constant 0 : i32
    return %arg0, %c0_i32, %c0_i32_0 : i32, i32, i32
  }
  func.func @transform_6(%arg0: i32) -> (i32, i32, i32) {
    %c0_i32 = arith.constant 0 : i32
    %c0_i32_0 = arith.constant 0 : i32
    %c0_i32_1 = arith.constant 0 : i32
    return %arg0, %c0_i32, %c0_i32_0 : i32, i32, i32
  }
  func.func @transform_7(%arg0: i32) -> (i32, i32, i32) {
    %c0_i32 = arith.constant 0 : i32
    %c0_i32_0 = arith.constant 0 : i32
    %c0_i32_1 = arith.constant 0 : i32
    return %arg0, %c0_i32, %c0_i32_0 : i32, i32, i32
  }
  func.func @transform_8(%arg0: i32) -> (i32, i32) {
    %c0_i32 = arith.constant 0 : i32
    %c0_i32_0 = arith.constant 0 : i32
    %c0_i32_1 = arith.constant 0 : i32
    return %c0_i32, %c0_i32_0 : i32, i32
  }
}

</mosaic_0001>

<bundles_post_ra>
// kernel: tpu_custom_call.1
= control target key start
LH: loop header
LB: loop body
LE: loop exit
PB: predicated region body
PF: predicated region fallthrough
CT: control target
= control target key end

     0   :  { %s1932_s0 = inlined_call_operand.hbm [shape: f32[8,128], index: 0, kind: input, shape index: {}]   ;;  %s1933_s1 = inlined_call_operand.vmem [shape: bf16[16,8], index: 1, kind: input, shape index: {}]   ;;  %s1934_s2 = inlined_call_operand.hbm [shape: bf16[8,16], index: 2, kind: input, shape index: {}]   ;;  %s1935_s3 = inlined_call_operand.hbm [shape: bf16[16,16], index: 3, kind: input, shape index: {}]   ;;  %s1936_s4 = inlined_call_operand.vmem [shape: bf16[3,16,128], index: 4, kind: input, shape index: {}]   ;;  %s1937_s5 = inlined_call_operand.hbm [shape: bf16[3,128,128], index: 5, kind: input, shape index: {}]   ;;  %s1938_s6 = inlined_call_operand.hbm [shape: bf16[3,128,128], index: 6, kind: input, shape index: {}]   ;;  %s1939_s7 = inlined_call_operand.hbm [shape: f32[3,8,128], index: 7, kind: input, shape index: {}]   ;;  %s1940_s8 = inlined_call_operand.hbm [shape: f32[8,128], index: 8, kind: output, shape index: {}]  }
   0x1   :  { %1959 = sst [smem:[#allocation22_spill]] %s1933_s1 }
   0x2   :  { %1960 = sst [smem:[#allocation23_spill]] %s1934_s2 }
   0x3   :  { %1961 = sst [smem:[#allocation24_spill]] %s1937_s5 }
   0x4   :  { %1962 = sst [smem:[#allocation25_spill]] %s1940_s8 }
   0x5   :  { %13 = vsyncpa [#allocation3], 0 }
   0x6   :  { %14 = vsyncpa [#allocation6], 0 }
   0x7   :  { %15 = vsyncpa [#allocation9], 0 }
   0x8   :  { %17 = vsyncpa [#allocation9 + $0x1], 0 }
   0x9   :  { %18 = vsyncpa [#allocation12], 0 }
   0xa   :  { %20 = vsyncpa [#allocation12 + $0x1], 0 }
   0xb   :  { %21 = vsyncpa [#allocation4], 0  ;;  %s1562_s27 = smov 0   ;;  %s1564_s28 = smov 0  }
   0xc   :  { %s1566_s29 = smov 0   ;;  %s1568_s30 = smov 0  }
   0xd LB: > { %1963 = sst [smem:[#allocation19_spill]] %s1500_s29  ;;  %s1581_s9 = sadd.s32 4294967295, %s1504_s30   ;;  %s1504_s30 = sphi %s1568_s30, %s1993_s30   ;;  %s1500_s29 = sphi %s1566_s29, %s1998_s29   ;;  %s1496_s28 = sphi %s1564_s28, %s1997_s28   ;;  %s1492_s27 = sphi %s1562_s27, %s1996_s27  }
   0xe   : > { %s1584_s10 = sadd.s32 1, %s1504_s30   ;;  %s144_s12 = sadd.s32 1, %s1500_s29 }
   0xf   : > { %1964 = sst [smem:[#allocation20_spill]] %s1584_s10  ;;  %s141_s11 = ssub.s32 %s1504_s30, %s1584_s10 }
  0x10   : > { %p142_p0 = scmp.eq.s32.totalorder %s141_s11, 0  ;;  %p151_p1 = scmp.ne.s32.totalorder %s1500_s29, %s1496_s28 }
  0x11   : > { %p152_p2 = scmp.eq.s32.totalorder %s1504_s30, 0  ;;  %p157_p3 = scmp.ne.s32.totalorder %s1496_s28, %s1492_s27 }
  0x12   : > { %s1594_s13 = scalar_select %p142_p0, %s1500_s29, %s144_s12  }
  0x13   : > { %p1596_p4 = por %p152_p2, %p151_p1  ;;  %p1941_p5 = scmp.eq.s32.totalorder %s1581_s9, 0 }
  0x14   : > { %1965 = sst [smem:[#allocation21_spill]] %s1594_s13  ;;  %p1001_p6 = scmp.ge.s32.totalorder %s1504_s30, 1 }
  0x15   : > { %s1966_s14 = scalar_select %p1596_p4, 1, 0 }
  0x16   : > { %p241_p7 = scmp.lt.s32.totalorder %s1504_s30, 4  ;;  %p1605_p8 = por %p1941_p5, %p157_p3 }
  0x17   : > { %s1506_s17 = smov [#allocation5]   ;;  %s300_s20 = sand.u32 1, %s1504_s30  }
  0x18   : > { %s1967_s15 = scalar_select %p1605_p8, 1, 0 }
  0x19   : > { %p1610_p10 = pnand %p1001_p6, %p241_p7  ;;  %s268_s18 = sshll.u32 %s1506_s17, 4  ;;  %s269_s18 = int_to_ptr.vmem [resolvable:$true] %s268_s18 }
  0x1a   : > { %s1625_s21 = sand.u32 1, %s1500_s29   ;;  %s1970_s2 = sld [smem:[#allocation23_spill]] }
  0x1b   : > { %s1968_s16 = scalar_select %p1610_p10, 1, 0 }
  0x1c   : > { %p1166_p11 = pneg %p1610_p10 }
  0x1e   : > { %p1618_p12 = pnand %p1166_p11, %p1941_p5 }
  0x20   : > { %s1969_s19 = scalar_select %p1618_p12, 1, 0 }
  0x21   : > { %s1254_s24 = scalar_lea.hbm %s1970_s2, 64  ;;  %p1635_p1 = pneg %p1618_p12 }
  0x22   : > { %p1255_p0 = scmp.ne.s32.totalorder %s1970_s2, %s1254_s24  ;;  %p1261_p6 = scmp.lt.u32.totalorder %s1254_s24, %s1970_s2 }
  0x23   : > { %s1971_s27 = scalar_select %p1635_p1, 1, 0 }
  0x24   : > { %p1257_p2 = pnand %p1635_p1, %p1255_p0 }
  0x26   : > { %p1258_p3 = pneg %p1257_p2 }
  0x28   : > { %p1263_p7 = pnand %p1261_p6, %p1258_p3 }
  0x2a   : > { %1266 = shalt.err (!%p1263_p7)
}
  0x2b   : > { %s1267_s17 = scalar_lea.vmem %s269_s18, 64  ;;  %p1275_p13 = scmp.lt.s32.totalorder %s269_s18, %s269_s18 }
  0x2c   : > { %p1268_p11 = scmp.ne.s32.totalorder %s269_s18, %s1267_s17  ;;  %p1276_p8 = scmp.lt.s32.totalorder %s1267_s17, %s1267_s17 }
  0x2e   : > { %p1270_p9 = pnand %p1268_p11, %p1635_p1  ;;  %p1277_p10 = por %p1276_p8, %p1275_p13 }
  0x30   : > { %p1271_p5 = pneg %p1270_p9 }
  0x32   : > { %p1278_p4 = pnand %p1277_p10, %p1271_p5 }
  0x34   : > { %1281 = shalt.err (!%p1278_p4)
}
  0x35   : > { %1172 = dma.hbm_to_vmem [thread:$0]  (!%p1618_p12), %s1970_s2, 64, %s269_s18, [#allocation6]  }
  0x36   : > { %s1944_s24 = sshll.u32 %s1625_s21, 6  ;;  %s1055_s25 = sshll.u32 %s1504_s30, 10 }
  0x37   : > { %s1972_s5 = sld [smem:[#allocation24_spill]]  ;;  %s304_s17 = scalar_lea.vmem [#allocation8], %s1944_s24 }
  0x38   : > { %s311_s22 = sshll.u32 %s304_s17, 4  ;;  %p1973_p4 = scmp.ne.s32.totalorder %s1966_s14, 0  ;;  %s1668_s22 = int_to_ptr.vmem [resolvable:$true] %s311_s22 }
  0x39   : > { %p1974_p5 = scmp.lt.s32.totalorder %s1504_s30, 3  ;;  %s1673_s11 = scalar_lea.hbm %s1938_s6, %s1055_s25 }
  0x3a   : > { %s1675_s2 = scalar_lea.sflag [#allocation9], %s300_s20 }
  0x3b   : > { %p1664_p8 = pnand %p1974_p5, %p1973_p4 }
  0x3d   : > { %s1656_s12 = scalar_lea.hbm %s1972_s5, %s1055_s25  ;;  %p1681_p10 = pneg %p1664_p8 }
  0x3e   : > { %s1975_s23 = scalar_select %p1664_p8, 1, 0 }
  0x3f   : > { %s1282_s13 = scalar_lea.hbm %s1656_s12, 1024  ;;  %s1287_s29 = scalar_lea.hbm %s1972_s5, 3072 }
  0x40   : > { %p1283_p9 = scmp.ne.s32.totalorder %s1656_s12, %s1282_s13  ;;  %p1288_p2 = scmp.lt.u32.totalorder %s1656_s12, %s1972_s5 }
  0x41   : > { %s1976_s14 = scalar_select %p1681_p10, 1, 0 }
  0x42   : > { %p1285_p13 = pnand %p1681_p10, %p1283_p9  ;;  %p1289_p3 = scmp.lt.u32.totalorder %s1287_s29, %s1282_s13 }
  0x43   : > { %p1291_p7 = scmp.lt.u32.totalorder %s1282_s13, %s1656_s12 }
  0x44   : > { %p1286_p0 = pneg %p1285_p13  ;;  %p1290_p6 = por %p1289_p3, %p1288_p2 }
  0x46   : > { %p1292_p11 = por %p1291_p7, %p1290_p6 }
  0x48   : > { %p1293_p4 = pnand %p1292_p11, %p1286_p0 }
  0x4a   : > { %1296 = shalt.err (!%p1293_p4)
}
  0x4b   : > { %s1297_s20 = scalar_lea.vmem %s1668_s22, 1024  ;;  %s1507_s24 = smov [#allocation8]  }
  0x4c   : > { %p1298_p5 = scmp.ne.s32.totalorder %s1668_s22, %s1297_s20  ;;  %s1302_s26 = sshll.u32 %s1507_s24, 4  ;;  %s1303_s26 = int_to_ptr.vmem [resolvable:$false] %s1302_s26 }
  0x4d   : > { %s1304_s17 = scalar_lea.vmem %s1303_s26, 2048  ;;  %p1305_p12 = scmp.lt.s32.totalorder %s1668_s22, %s1303_s26 }
  0x4e   : > { %p1300_p9 = pnand %p1298_p5, %p1681_p10  ;;  %p1306_p1 = scmp.lt.s32.totalorder %s1304_s17, %s1297_s20 }
  0x50   : > { %p1301_p13 = pneg %p1300_p9  ;;  %p1307_p2 = por %p1306_p1, %p1305_p12 }
  0x52   : > { %p1308_p3 = pnand %p1307_p2, %p1301_p13 }
  0x54   : > { %1311 = shalt.err (!%p1308_p3)
}
  0x55   : > { %s1955_s29 = smov 64   ;;  %s1509_s13 = smov 4  }
  0x56   : > { %1179 = dma.hbm_to_vmem [thread:$0]  (!%p1664_p8), %s1656_s12, 1024, %s1668_s22, %s1675_s2, %s1955_s29, %s1955_s29, %s1509_s13  }
  0x57   : > { %s1977_s18 = sshll.u32 %s1625_s21, 6  ;;  %s1510_s20 = smov [#allocation2]  }
  0x58   : > { %s325_s25 = scalar_lea.vmem [#allocation10], %s1977_s18  ;;  %s254_s26 = sshll.u32 %s1510_s20, 4  ;;  %s255_s26 = int_to_ptr.vmem [resolvable:$true] %s254_s26 }
  0x59   : > { %s332_s24 = sshll.u32 %s325_s25, 4  ;;  %s1312_s10 = scalar_lea.hbm %s1932_s0, 128  ;;  %s1710_s24 = int_to_ptr.vmem [resolvable:$true] %s332_s24 }
  0x5a   : > { %p1313_p12 = scmp.ne.s32.totalorder %s1932_s0, %s1312_s10  ;;  %p1978_p1 = scmp.ne.s32.totalorder %s1971_s27, 0 }
  0x5b   : > { %p1319_p7 = scmp.lt.u32.totalorder %s1312_s10, %s1932_s0 }
  0x5c   : > { %p1315_p0 = pnand %p1313_p12, %p1978_p1 }
  0x5e   : > { %p1316_p6 = pneg %p1315_p0 }
  0x60   : > { %p1321_p11 = pnand %p1319_p7, %p1316_p6 }
  0x62   : > { %1324 = shalt.err (!%p1321_p11)
}
  0x63   : > { %s1325_s18 = scalar_lea.vmem %s255_s26, 128  ;;  %p1333_p13 = scmp.lt.s32.totalorder %s255_s26, %s255_s26 }
  0x64   : > { %p1326_p4 = scmp.ne.s32.totalorder %s255_s26, %s1325_s18  ;;  %p1334_p2 = scmp.lt.s32.totalorder %s1325_s18, %s1325_s18 }
  0x66   : > { %p1328_p5 = pnand %p1326_p4, %p1978_p1  ;;  %p1335_p3 = por %p1334_p2, %p1333_p13 }
  0x68   : > { %p1329_p9 = pneg %p1328_p5 }
  0x6a   : > { %p1336_p8 = pnand %p1335_p3, %p1329_p9 }
  0x6c   : > { %1339 = shalt.err (!%p1336_p8)
}
  0x6d   : > { %p1979_p12 = scmp.ne.s32.totalorder %s1969_s19, 0  ;;  %s1511_s8 = smov [#allocation7]  }
  0x6e   : > { %s278_s10 = sshll.u32 %s1511_s8, 4  ;;  %s1012_s25 = sshll.u32 %s1625_s21, 3  ;;  %s279_s10 = int_to_ptr.vmem [resolvable:$true] %s278_s10 }
  0x6f   : > { %1169 = dma.hbm_to_vmem [thread:$0]  (!%p1979_p12), %s1932_s0, 128, %s255_s26, [#allocation3]  }
  0x70   : > { %s1340_s12 = scalar_lea.hbm %s1935_s3, 128 }
  0x71   : > { %p1341_p8 = scmp.ne.s32.totalorder %s1935_s3, %s1340_s12  ;;  %p1347_p7 = scmp.lt.u32.totalorder %s1340_s12, %s1935_s3 }
  0x73   : > { %p1343_p0 = pnand %p1341_p8, %p1978_p1 }
  0x75   : > { %p1344_p6 = pneg %p1343_p0 }
  0x77   : > { %p1349_p11 = pnand %p1347_p7, %p1344_p6 }
  0x79   : > { %1352 = shalt.err (!%p1349_p11)
}
  0x7a   : > { %s1353_s26 = scalar_lea.vmem %s279_s10, 128  ;;  %p1361_p13 = scmp.lt.s32.totalorder %s279_s10, %s279_s10 }
  0x7b   : > { %p1354_p4 = scmp.ne.s32.totalorder %s279_s10, %s1353_s26  ;;  %p1362_p2 = scmp.lt.s32.totalorder %s1353_s26, %s1353_s26 }
  0x7d   : > { %p1356_p5 = pnand %p1354_p4, %p1978_p1  ;;  %p1363_p3 = por %p1362_p2, %p1361_p13 }
  0x7f   : > { %p1357_p9 = pneg %p1356_p5 }
  0x81   : > { %p1364_p10 = pnand %p1363_p3, %p1357_p9 }
  0x83   : > { %1367 = shalt.err (!%p1364_p10)
}
  0x84   : > { %s1980_s5 = smov 64   ;;  %s1368_s27 = scalar_lea.hbm %s1673_s11, 1024 }
  0x85   : > { %1175 = dma.hbm_to_vmem [thread:$0]  (!%p1979_p12), %s1935_s3, 128, %s279_s10, [#allocation6], %s1980_s5, %s1980_s5, %s1509_s13  }
  0x86   : > { %p1369_p1 = scmp.ne.s32.totalorder %s1673_s11, %s1368_s27  ;;  %p1981_p8 = scmp.ne.s32.totalorder %s1976_s14, 0 }
  0x87   : > { %s1373_s19 = scalar_lea.hbm %s1938_s6, 3072  ;;  %p1374_p10 = scmp.lt.u32.totalorder %s1673_s11, %s1938_s6 }
  0x88   : > { %p1371_p0 = pnand %p1369_p1, %p1981_p8  ;;  %p1375_p7 = scmp.lt.u32.totalorder %s1373_s19, %s1368_s27 }
  0x89   : > { %p1377_p4 = scmp.lt.u32.totalorder %s1368_s27, %s1673_s11 }
  0x8a   : > { %p1372_p6 = pneg %p1371_p0  ;;  %p1376_p11 = por %p1375_p7, %p1374_p10 }
  0x8c   : > { %p1378_p5 = por %p1377_p4, %p1376_p11 }
  0x8e   : > { %p1379_p9 = pnand %p1378_p5, %p1372_p6 }
  0x90   : > { %1382 = shalt.err (!%p1379_p9)
}
  0x91   : > { %s1383_s10 = scalar_lea.vmem %s1710_s24, 1024  ;;  %s1512_s18 = smov [#allocation10]  }
  0x92   : > { %p1384_p12 = scmp.ne.s32.totalorder %s1710_s24, %s1383_s10  ;;  %s1388_s1 = sshll.u32 %s1512_s18, 4  ;;  %s1389_s1 = int_to_ptr.vmem [resolvable:$false] %s1388_s1 }
  0x93   : > { %s1390_s26 = scalar_lea.vmem %s1389_s1, 2048  ;;  %p1391_p3 = scmp.lt.s32.totalorder %s1710_s24, %s1389_s1 }
  0x94   : > { %p1386_p13 = pnand %p1384_p12, %p1981_p8  ;;  %p1392_p1 = scmp.lt.s32.totalorder %s1390_s26, %s1383_s10 }
  0x96   : > { %p1387_p2 = pneg %p1386_p13  ;;  %p1393_p0 = por %p1392_p1, %p1391_p3 }
  0x98   : > { %p1394_p10 = pnand %p1393_p0, %p1387_p2 }
  0x9a   : > { %1397 = shalt.err (!%p1394_p10)
}
  0x9b   : > { %p1982_p6 = scmp.ne.s32.totalorder %s1975_s23, 0  ;;  %s1013_s29 = sshll.u32 %s1504_s30, 7 }
  0x9c   : > { %s1781_s20 = scalar_lea.hbm %s1939_s7, %s1013_s29  ;;  %s346_s17 = scalar_lea.vmem [#allocation11], %s1012_s25 }
  0x9d   : > { %1182 = dma.hbm_to_vmem [thread:$0]  (!%p1982_p6), %s1673_s11, 1024, %s1710_s24, %s1675_s2, %s1980_s5, %s1980_s5, %s1509_s13  }
  0x9e   : > { %s353_s19 = sshll.u32 %s346_s17, 4  ;;  %s343_s12 = scalar_lea.sflag [#allocation12], %s1625_s21  ;;  %s354_s19 = int_to_ptr.vmem [resolvable:$true] %s353_s19 }
  0x9f   : > { %s1398_s22 = scalar_lea.hbm %s1781_s20, 128  ;;  %s1403_s11 = scalar_lea.hbm %s1939_s7, 384 }
  0xa0   : > { %p1399_p7 = scmp.ne.s32.totalorder %s1781_s20, %s1398_s22  ;;  %p1404_p5 = scmp.lt.u32.totalorder %s1781_s20, %s1939_s7 }
  0xa1   : > { %p1405_p9 = scmp.lt.u32.totalorder %s1403_s11, %s1398_s22  ;;  %p1407_p13 = scmp.lt.u32.totalorder %s1398_s22, %s1781_s20 }
  0xa2   : > { %p1401_p11 = pnand %p1399_p7, %p1981_p8 }
  0xa3   : > { %p1406_p12 = por %p1405_p9, %p1404_p5 }
  0xa4   : > { %p1402_p4 = pneg %p1401_p11 }
  0xa5   : > { %p1408_p2 = por %p1407_p13, %p1406_p12 }
  0xa7   : > { %p1409_p3 = pnand %p1408_p2, %p1402_p4 }
  0xa9   : > { %1412 = shalt.err (!%p1409_p3)
}
  0xaa   : > { %s1413_s21 = scalar_lea.vmem %s354_s19, 128  ;;  %s1513_s25 = smov [#allocation11]  }
  0xab   : > { %p1414_p1 = scmp.ne.s32.totalorder %s354_s19, %s1413_s21  ;;  %s1418_s5 = sshll.u32 %s1513_s25, 4  ;;  %s1419_s5 = int_to_ptr.vmem [resolvable:$false] %s1418_s5 }
  0xac   : > { %s1420_s10 = scalar_lea.vmem %s1419_s5, 256  ;;  %p1421_p7 = scmp.lt.s32.totalorder %s354_s19, %s1419_s5 }
  0xad   : > { %p1416_p0 = pnand %p1414_p1, %p1981_p8  ;;  %p1422_p11 = scmp.lt.s32.totalorder %s1420_s10, %s1413_s21 }
  0xaf   : > { %p1417_p10 = pneg %p1416_p0  ;;  %p1423_p6 = por %p1422_p11, %p1421_p7 }
  0xb1   : > { %p1424_p5 = pnand %p1423_p6, %p1417_p10 }
  0xb3   : > { %1427 = shalt.err (!%p1424_p5)
}
  0xb4   : > { %p1983_p9 = scmp.ne.s32.totalorder %s1975_s23, 0  ;;  %p1984_p4 = scmp.ne.s32.totalorder %s1968_s16, 0 }
  0xb5   : > { %p1985_p12 = scmp.eq.s32.totalorder (!%p1984_p4), %s1581_s9, 0 }
  0xb6   : > { %1185 = dma.hbm_to_vmem [thread:$0]  (!%p1983_p9), %s1781_s20, 128, %s354_s19, %s343_s12  }
  0xb7   : > { %362 = sbr.rel (%p1984_p4) target bundleno = 1142 (0x476), region = 52 }
  0xbe   : > { %1471 = dma.done.wait (%p1985_p12), [#allocation3], 128   ;;  %p1986_p8 = pmov %p1985_p12 }
  0xc0   : > { %1473 = vsyncadd (%p1986_p8), [#allocation3], 4294967168  ;;  %p1987_p13 = pmov %p1986_p8 }
  0xc1   : > { %p1988_p2 = pmov %p1986_p8 }
  0xc2   : > { %1475 = dma.done.wait (%p1987_p13), [#allocation6], 192  }
  0xc3   : > { %1477 = vsyncadd (%p1988_p2), [#allocation6], 4294967104  ;;  %s376_s23 = sand.u32 1, %s1581_s9   ;;  %s378_s14 = sand.u32 1, %s1496_s28  }
  0xc4   : > { %s1018_s18 = sshll.u32 %s378_s14, 6  ;;  %s377_s16 = scalar_lea.sflag [#allocation9], %s376_s23 }
  0xc5   : > { %s1815_s1 = scalar_lea.vmem [#allocation8], %s1018_s18  ;;  %p1989_p6 = scmp.ne.s32.totalorder %s1967_s15, 0 }
  0xc7   : > { %1479 = dma.done.wait (%p1989_p6), %s377_s16, 2048  }
  0xc8   : > { %1481 = vsyncadd (%p1989_p6), %s377_s16, 4294965248  ;;  %s1020_s26 = sshll.u32 %s378_s14, 3  ;;  %s1821_s29 = scalar_lea.vmem [#allocation10], %s1018_s18 }
  0xc9   : > { %s395_s8 = scalar_lea.sflag [#allocation12], %s378_s14  ;;  %s1823_s27 = scalar_lea.vmem [#allocation11], %s1020_s26 }
  0xca   : > { %1483 = dma.done.wait (%p1989_p6), %s395_s8, 128  }
  0xcb   : > { %1485 = vsyncadd (%p1989_p6), %s395_s8, 4294967168  ;;  %p441_p3 = scmp.lt.s32.totalorder %s1581_s9, 2  ;;  %p1990_p1 = scmp.ne.s32.totalorder %s1581_s9, 0 }
  0xcc   : > { %v451_v0 = vld [vmem:[#allocation2] sm:$0xff] (!%p1990_p1) }
  0xcd   : > { %s442_s20 = scalar_select %p441_p3, %s1581_s9, 2 }
  0xce   : > { %450 = sbr.rel (%p1990_p1) target bundleno = 213 (0xd5), region = 80  ;;  %452 = vst [vmem:[#allocation13] sm:$0xff] (!%p1990_p1), %v451_v0 }
  0xcf   : > { %s1057_s17 = sshll.u32 %s442_s20, 3 }
  0xd0   : > { %s445_s22 = scalar_lea.vmem %s1936_s4, %s1057_s17 }
  0xd5 PF: > { %v1235_v1 = vld [vmem:[%s445_s22] sm:$0xff]   ;;  %v1514_v2 = vmov 0.0   ;;  %v1236_v3 = vld [vmem:[#allocation7] sm:$0xff]   ;;  %vm1515_vm0 = vmmov 0   ;;  %vm469_vm1 = vcmask 130048   ;;  %vm526_vm2 = vcmask 1043456  }
  0xd6   : > { %1082 = vmatprep.subr.bf16.mxu0 %v1514_v2  ;;  %1094 = vmatprep.subr.bf16.mxu1 %v1514_v2  ;;  %v1840_v4 = vld [vmem:[#allocation13] sm:$0xff]  ;;  %s1991_s30 = sld [smem:[#allocation22_spill]]  ;;  %vm522_vm3 = vcmask 64512   ;;  %v1238_v16 = vld [vmem:[%s1815_s1] sm:$0xff]   ;;  %v1239_v17 = vld [vmem:[%s1815_s1 + $0x8] sm:$0xff]   ;;  %p1049_p0 = scmp.ge.s32.totalorder %s1581_s9, 2 }
  0xd7   : > { %1083 = vmatpush3.bf16.msra.mxu0 %v1235_v1  ;;  %1084 = vmatprep.mubr.msk.bf16.mxu0 %vm1515_vm0, %v1514_v2  ;;  %v516_v5 = vpack.c.bf16 %v1840_v4, %v1840_v4  ;;  %v573_v15 = vld [vmem:[#allocation5] sm:$0xf]  ;;  %v1241_v19 = vld [vmem:[%s1815_s1 + $0x18] sm:$0xff]   ;;  %v1242_v20 = vld [vmem:[%s1815_s1 + $0x20] sm:$0xff]  }
  0xd8   : > { %1088 = vmatprep.subr.bf16.mxu0 %v1514_v2  ;;  %1096 = vmatprep.mubr.msk.bf16.mxu1 %vm1515_vm0, %v1514_v2  ;;  %v1240_v18 = vld [vmem:[%s1815_s1 + $0x10] sm:$0xff]   ;;  %v1243_v21 = vld [vmem:[%s1815_s1 + $0x28] sm:$0xff]   ;;  %v1245_v23 = vld [vmem:[%s1815_s1 + $0x38] sm:$0xff]  }
  0xd9   : > { %v528_v6 = vsel %vm526_vm2, %v516_v5, 0  ;;  %v1244_v22 = vld [vmem:[%s1815_s1 + $0x30] sm:$0xff]   ;;  %v1246_v24 = vld [vmem:[%s1821_s29] sm:$0xff]   ;;  %v1247_v25 = vld [vmem:[%s1821_s29 + $0x8] sm:$0xff]  }
  0xda   : > { %1085 = vmatmul.mubr.msk.bf16.vlgmr.msra.gmra.mrb[0].mxu0 %vm469_vm1, %v1236_v3  ;;  %v1248_v26 = vld [vmem:[%s1821_s29 + $0x10] sm:$0xff]   ;;  %v1249_v27 = vld [vmem:[%s1821_s29 + $0x18] sm:$0xff]   ;;  %v1250_v28 = vld [vmem:[%s1821_s29 + $0x20] sm:$0xff]  }
  0xdb   : > { %1089 = vmatpush3.bf16.msra.mxu0 %v528_v6  ;;  %1090 = vmatprep.mubr.msk.bf16.mxu0 %vm1515_vm0, %v1514_v2  ;;  %v1251_v29 = vld [vmem:[%s1821_s29 + $0x28] sm:$0xff]   ;;  %v1252_v38 = vld [vmem:[%s1821_s29 + $0x30] sm:$0xff]   ;;  %v1253_v39 = vld [vmem:[%s1821_s29 + $0x38] sm:$0xff]  }
  0xdc   : > { %1120 = vmatprep.subr.bf16.mxu0 %v1514_v2  ;;  %v1237_v7 = vld [vmem:[%s1991_s30] sm:$0xff]   ;;  %v1030_v30 = vld [vmem:[%s1823_s27 + $0x2] ss:$0 sm:$0xff]  ;;  %v1031_v40 = vld [vmem:[%s1823_s27] ss:$0 sm:$0xff] }
  0xdd   : > { %v623_v31 = vmul.f32 %v1030_v30, %v1840_v4  ;;  %v1040_v48 = vld [vmem:[%s1823_s27 + $0x1] ss:$0 sm:$0xff] }
  0xe6   : > { %1091 = vmatmul.mubr.msk.bf16.vlgmr.msra.gmra.mrb[0].mxu0 %vm522_vm3, %v1237_v7 }
  0xe7   : > { %1136 = vmatprep.mubr.msk.bf16.mxu0 %vm1515_vm0, %v1514_v2  ;;  %1121 = vmatpush3.bf16.msra.mxu0 %v1246_v24 }
  0xe8   : > { %1122 = vmatprep.subr.bf16.mxu0 %v1514_v2 }
  0xeb   : > { %1123 = vmatpush3.bf16.msra.mxu0 %v1247_v25 }
  0xec   : > { %1124 = vmatprep.subr.bf16.mxu0 %v1514_v2 }
  0xef   : > { %1125 = vmatpush3.bf16.msra.mxu0 %v1248_v26 }
  0xf0   : > { %1126 = vmatprep.subr.bf16.mxu0 %v1514_v2 }
  0xf3   : > { %1127 = vmatpush3.bf16.msra.mxu0 %v1249_v27 }
  0xf4   : > { %1128 = vmatprep.subr.bf16.mxu0 %v1514_v2 }
  0xf7   : > { %1129 = vmatpush3.bf16.msra.mxu0 %v1250_v28 }
  0xf8   : > { %1130 = vmatprep.subr.bf16.mxu0 %v1514_v2 }
  0xfb   : > { %1131 = vmatpush3.bf16.msra.mxu0 %v1251_v29 }
  0xfc   : > { %1132 = vmatprep.subr.bf16.mxu0 %v1514_v2 }
  0xff   : > { %1133 = vmatpush3.bf16.msra.mxu0 %v1252_v38 }
 0x100   : > { %1134 = vmatprep.subr.bf16.mxu0 %v1514_v2 }
 0x103   : > { %1135 = vmatpush3.bf16.msra.mxu0 %v1253_v39 }
 0x1b9   : > { %v564_v8 = vpop.f32.mrb[0].mxu0 }
 0x1ba   : > { %v1092_v9 = vpop.f32.mrb[1].mxu0  ;;  %v571_v11 = vmax.f32 %v564_v8, 0.0 }
 0x1bb   : > { %v567_v10 = vpop.f32.mrb[2].mxu0 }
 0x1bc   : > { %v572_v12 = vmax.f32 %v567_v10, 0.0  ;;  %v1093_v13 = vpop.f32.mrb[3].mxu0 }
 0x1be   : > { %v574_v14 = vpack.c.bf16 %v572_v12, %v571_v11 }
 0x1c0   : > { %1095 = vmatpush3.bf16.msra.mxu1 %v574_v14 }
 0x1c1   : > { %1100 = vmatprep.subr.bf16.mxu1 %v1514_v2 }
 0x1c3   : > { %1097 = vmatmul.mubr.msk.bf16.vlgmr.msra.gmra.mrb[0].mxu1 %vm469_vm1, %v573_v15 }
 0x1c4   : > { %1101 = vmatpush3.bf16.msra.mxu1 %v1238_v16  ;;  %1116 = vmatprep.mubr.msk.bf16.mxu1 %vm1515_vm0, %v1514_v2 }
 0x1c5   : > { %1102 = vmatprep.subr.bf16.mxu1 %v1514_v2 }
 0x1c8   : > { %1103 = vmatpush3.bf16.msra.mxu1 %v1239_v17 }
 0x1c9   : > { %1104 = vmatprep.subr.bf16.mxu1 %v1514_v2 }
 0x1cc   : > { %1105 = vmatpush3.bf16.msra.mxu1 %v1240_v18 }
 0x1cd   : > { %1106 = vmatprep.subr.bf16.mxu1 %v1514_v2 }
 0x1d0   : > { %1107 = vmatpush3.bf16.msra.mxu1 %v1241_v19 }
 0x1d1   : > { %1108 = vmatprep.subr.bf16.mxu1 %v1514_v2 }
 0x1d4   : > { %1109 = vmatpush3.bf16.msra.mxu1 %v1242_v20 }
 0x1d5   : > { %1110 = vmatprep.subr.bf16.mxu1 %v1514_v2 }
 0x1d8   : > { %1111 = vmatpush3.bf16.msra.mxu1 %v1243_v21 }
 0x1d9   : > { %1112 = vmatprep.subr.bf16.mxu1 %v1514_v2 }
 0x1dc   : > { %1113 = vmatpush3.bf16.msra.mxu1 %v1244_v22 }
 0x1dd   : > { %1114 = vmatprep.subr.bf16.mxu1 %v1514_v2 }
 0x1e0   : > { %1115 = vmatpush3.bf16.msra.mxu1 %v1245_v23 }
 0x296   : > { %v612_v32 = vpop.f32.mrb[0].mxu1 }
 0x297   : > { %v624_v33 = vadd.f32 %v623_v31, %v612_v32  ;;  %v1098_v34 = vpop.f32.mrb[1].mxu1 }
 0x298   : > { %v615_v35 = vpop.f32.mrb[2].mxu1 }
 0x299   : > { %v625_v36 = vpack.c.bf16 %v624_v33, %v624_v33  ;;  %v1099_v37 = vpop.f32.mrb[3].mxu1 }
 0x29b   : > { %1117 = vmatmul.mubr.bf16.vlgmr.msra.gmra.mrb[4].mxu1 %v625_v36 }
 0x36e   : > { %v729_v41 = vpop.f32.mrb[4].mxu1 }
 0x36f   : > { %v730_v42 = vadd.f32 %v1031_v40, %v729_v41  ;;  %v1118_v43 = vpop.f32.mrb[5].mxu1 }
 0x370   : > { %v732_v44 = vpop.f32.mrb[6].mxu1 }
 0x371   : > { %v735_v45 = vmax.f32 %v730_v42, 0.0  ;;  %v1119_v46 = vpop.f32.mrb[7].mxu1 }
 0x373   : > { %v736_v47 = vpack.c.bf16 %v735_v45, %v735_v45 }
 0x375   : > { %1137 = vmatmul.mubr.bf16.vlgmr.msra.gmra.mrb[4].mxu0 %v736_v47 }
 0x445   : > { %849 = sbr.rel (%p1049_p0) target bundleno = 1102 (0x44e), region = 84 }
 0x448   : > { %v840_v49 = vpop.f32.mrb[4].mxu0 }
 0x449   : > { %v841_v50 = vadd.f32 %v1040_v48, %v840_v49  ;;  %v1138_v51 = vpop.f32.mrb[5].mxu0 }
 0x44a   : > { %v843_v52 = vpop.f32.mrb[6].mxu0 }
 0x44b   : > { %v1139_v53 = vpop.f32.mrb[7].mxu0  ;;  %v850_v54 = vmax.f32 (!%p1049_p0), %v841_v50, 0.0 }
 0x44d   : > { %851 = vst [vmem:[#allocation13] sm:$0xff] %v850_v54 }
 0x44e PF: > { %p1050_p10 = scmp.ne.s32.totalorder %s1581_s9, 2 }
 0x44f   : > { %856 = vst [vmem:[#allocation13] sm:$0xff] (!%p1050_p10), %v841_v50 }
 0x450   : > { %855 = sbr.rel (%p1050_p10) target bundleno = 1111 (0x457), region = 88 }
 0x457 PF: > { %p1193_p7 = scmp.eq.s32.totalorder %s1581_s9, 2  ;;  %s1516_s11 = smov [#allocation13]  }
 0x458   : > { %s864_s13 = sshll.u32 %s1516_s11, 4  ;;  %s865_s13 = int_to_ptr.vmem [resolvable:$true] %s864_s13 }
 0x459   : > { %s1428_s24 = scalar_lea.vmem %s865_s13, 128  ;;  %p1435_p4 = scmp.lt.s32.totalorder %s865_s13, %s865_s13 }
 0x45a   : > { %p1429_p11 = scmp.ne.s32.totalorder %s865_s13, %s1428_s24  ;;  %p1436_p12 = scmp.lt.s32.totalorder %s1428_s24, %s1428_s24 }
 0x45c   : > { %p1430_p5 = pnand %p1429_p11, %p1193_p7  ;;  %p1437_p8 = por %p1436_p12, %p1435_p4 }
 0x45e   : > { %p1431_p9 = pneg %p1430_p5 }
 0x460   : > { %p1438_p13 = pnand %p1437_p8, %p1431_p9 }
 0x462   : > { %1441 = shalt.err (!%p1438_p13)
}
 0x463   : > { %s1992_s5 = sld [smem:[#allocation25_spill]] }
 0x469   : > { %s1442_s10 = scalar_lea.hbm %s1992_s5, 128 }
 0x46a   : > { %p1443_p2 = scmp.ne.s32.totalorder %s1992_s5, %s1442_s10  ;;  %p1448_p1 = scmp.lt.u32.totalorder %s1442_s10, %s1992_s5 }
 0x46c   : > { %p1444_p6 = pnand %p1443_p2, %p1193_p7 }
 0x46e   : > { %p1445_p3 = pneg %p1444_p6 }
 0x470   : > { %p1450_p0 = pnand %p1448_p1, %p1445_p3 }
 0x472   : > { %1453 = shalt.err (!%p1450_p0)
}
 0x473   : > { %1163 = dma.vmem_to_hbm [thread:$0]  (%p1193_p7), %s865_s13, 128, %s1992_s5, [#allocation4]  }
 0x474   : > { %1487 = dma.done.wait (%p1193_p7), [#allocation4], 128  }
 0x475   : > { %1489 = vsyncadd (%p1193_p7), [#allocation4], 4294967168 }
 0x476 PF: > { %s1993_s30 = sld [smem:[#allocation20_spill]]  ;;  %s1994_s29 = sld [smem:[#allocation19_spill]] }
 0x477   : > { %s1995_s8 = sld [smem:[#allocation21_spill]]  ;;  %s1996_s27 = smov %s1496_s28 }
 0x47c   : > { %p24_p10 = scmp.ge.s32.totalorder %s1993_s30, 5   ;;  %s1997_s28 = smov %s1994_s29 }
 0x47d   : > { %s1998_s29 = smov %s1995_s8 }
 0x47e   :  { %26 = sbr.rel (!%p24_p10) target bundleno = 13 (0xd), region = 141 }
 0x485   :  { %877 = vsyncpa [#allocation3], 1 }
 0x486   :  { %879 = vsyncpa [#allocation3 + $0x1], 1 }
 0x487   :  { %880 = vsyncpa [#allocation6], 1 }
 0x488   :  { %881 = vsyncpa [#allocation9], 1 }
 0x489   :  { %883 = vsyncpa [#allocation9 + $0x1], 1 }
 0x48a   :  { %884 = vsyncpa [#allocation12], 1 }
 0x48b   :  { %886 = vsyncpa [#allocation12 + $0x1], 1 }
 0x48c   :  { %887 = vsyncpa [#allocation4], 1 }
 0x48d   :  { %889 = vsyncpa [#allocation4 + $0x1], 1 }

</bundles_post_ra>
